<compile_context>
chip_gen: v7x
topology: tpu7x:2x2x1
jax: 0.10.0
libtpu: 0.0.40
codegen_flags: <defaults>
</compile_context>

<pallas_src>
import functools
import numpy as np
import jax
import jax.numpy as jnp
from jax import lax
from jax.experimental import pallas as pl
from jax.experimental.pallas import tpu as pltpu


def _round_up(x, m):
    return ((x + m - 1) // m) * m


def _d_tile(D):
    # Tile along d_model: either the full axis or a multiple of 128 so that
    # both (TD, S) and (S, TD) blocks satisfy the (8, 128) layout rule.
    return min(D, 256) if D % 128 == 0 else D


def _row_tile(S):
    # Row tile of the (S, S) magnitude matrix: single tile for ViT-sized S,
    # 256 rows for long sequences (bounds the S^2 temporaries in VMEM).
    return S if S <= 256 else 256


# ----------------------------------------------------------------------------
# Kernel A: fused Q/K/V projection  (Linear over the sequence axis)
#   out[b, d, s_out] = sum_{s_in} x[b, s_in, d] * W[s_out, s_in] + bias[s_out]
# ----------------------------------------------------------------------------
def _qkv_kernel(x_ref, wq_ref, wk_ref, wv_ref, bq_ref, bk_ref, bv_ref,
                q_ref, k_ref, v_ref):
    xb = x_ref[0]                                   # (S_in, TD)

    def lin(w_ref, b_ref):
        y = lax.dot_general(xb, w_ref[...], (((0,), (1,)), ((), ())),
                            preferred_element_type=jnp.float32)   # (TD, S_out)
        return y + b_ref[...]                       # bias (1, S_out) broadcast

    q_ref[0] = lin(wq_ref, bq_ref)
    k_ref[0] = lin(wk_ref, bk_ref)
    v_ref[0] = lin(wv_ref, bv_ref)


def pallas_qkv_proj(x, wq, bq, wk, bk, wv, bv, *, d_tile=None):
    B, S, D = x.shape
    TD = d_tile if d_tile is not None else _d_tile(D)
    nd = pl.cdiv(D, TD)
    out_sds = jax.ShapeDtypeStruct((B, D, S), jnp.float32)
    full_w = pl.BlockSpec((S, S), lambda b, d: (0, 0))
    full_b = pl.BlockSpec((1, S), lambda b, d: (0, 0))
    out_spec = pl.BlockSpec((1, TD, S), lambda b, d: (b, d, 0))
    return pl.pallas_call(
        _qkv_kernel,
        out_shape=(out_sds, out_sds, out_sds),
        grid=(B, nd),
        in_specs=[
            pl.BlockSpec((1, S, TD), lambda b, d: (b, 0, d)),
            full_w, full_w, full_w, full_b, full_b, full_b,
        ],
        out_specs=(out_spec, out_spec, out_spec),
        compiler_params=pltpu.CompilerParams(
            dimension_semantics=("parallel", "parallel")),
    )(x, wq, wk, wv, bq.reshape(1, S), bk.reshape(1, S), bv.reshape(1, S))


# ----------------------------------------------------------------------------
# Kernel B: magnitude matrix + top-K select + Conv1d (stride=K)
#   out[o, i] = b[o] + sum_j sum_c W[o, c, j] * v[c, idx[i, j]]
# Gather is realized as one-hot matmuls so everything stays on the MXU.
# ----------------------------------------------------------------------------
def _attn_conv_kernel(kf_ref, qf_ref, kr_ref, qr_ref, v_ref, w_ref, b_ref,
                      o_ref, wv_scr, sel_scr, *, K, maximum):
    S = qf_ref.shape[2]
    TI = kr_ref.shape[2]
    S_pad = wv_scr.shape[1] // K                    # lane-aligned segment size

    qf = qf_ref[0]                                  # (d_k, S)   all columns j
    kr = kr_ref[0]                                  # (d_k, TI)  row slice i
    v = v_ref[0]                                    # (d_k, S)

    if maximum:  # 'similarity'
        eps2 = jnp.float32(1e-24)                   # == F.normalize eps=1e-12
        qn = qf * lax.rsqrt(jnp.maximum(jnp.sum(qf * qf, axis=0, keepdims=True), eps2))
        kn = kr * lax.rsqrt(jnp.maximum(jnp.sum(kr * kr, axis=0, keepdims=True), eps2))
        mag = lax.dot_general(kn, qn, (((0,), (0,)), ((), ())),
                              preferred_element_type=jnp.float32)   # (TI, S)
        mag = jnp.maximum(mag, 0.0)
        fill = -jnp.inf
    else:        # 'distance'
        kf = kf_ref[0]                              # (d_k, S)
        qr = qr_ref[0]                              # (d_k, TI)
        k2 = jnp.sum(kf * kf, axis=0, keepdims=True)                # (1, S)
        q2 = jnp.sum(qr * qr, axis=0, keepdims=True).T              # (TI, 1)
        dot = lax.dot_general(kr, qf, (((0,), (0,)), ((), ())),
                              preferred_element_type=jnp.float32)   # (TI, S)
        # matches torch: dist[i, j] = ||k_j||^2 + ||q_i||^2 - 2 * k_i . q_j
        mag = jnp.maximum(k2 + q2 - 2.0 * dot, 0.0)
        # NOTE: torch applies sqrt here; it is dropped because sqrt is
        # monotonic and mag is used only for top-K selection (same indices).
        fill = jnp.inf

    # Zero the scratch only when the lane padding region exists (keeps the
    # padded columns of the big contraction at exactly 0).
    if S_pad != S:
        wv_scr[...] = jnp.zeros(wv_scr.shape, jnp.float32)
        sel_scr[...] = jnp.zeros(sel_scr.shape, jnp.float32)

    # K tiny weight matmuls: Wv_j[o, t] = sum_c W[o, c, j] * v[c, t]
    for j in range(K):
        wv_scr[:, j * S_pad:j * S_pad + S] = jnp.dot(
            w_ref[j], v, preferred_element_type=jnp.float32)

    # Row-wise iterative top-K with first-occurrence tie break; the K one-hot
    # selection matrices are packed into a single (TI, K*S_pad) operand.
    col = lax.broadcasted_iota(jnp.int32, (TI, S), 1)
    work = mag
    for j in range(K):
        if maximum:
            best = jnp.max(work, axis=-1, keepdims=True)
        else:
            best = jnp.min(work, axis=-1, keepdims=True)
        pos = jnp.min(jnp.where(work == best, col, S), axis=-1, keepdims=True)
        onehot = col == pos                         # (TI, S): row i picks idx[i, j]
        sel_scr[:, j * S_pad:j * S_pad + S] = onehot.astype(jnp.float32)
        work = jnp.where(onehot, fill, work)

    # One large MXU contraction:
    #   acc[o, i] = sum_{j, t} Wv[o, j*S_pad + t] * sel[i, j*S_pad + t]
    acc = lax.dot_general(wv_scr[...], sel_scr[...], (((1,), (1,)), ((), ())),
                          preferred_element_type=jnp.float32)       # (d_k, TI)
    o_ref[0] = acc + b_ref[...]


def pallas_attn_conv(q, k, v, conv_w_k_first, conv_b, *, K, magnitude_type,
                     row_tile=None):
    BH, d_k, S = q.shape
    TI = row_tile if row_tile is not None else _row_tile(S)
    ni = pl.cdiv(S, TI)
    S_pad = _round_up(S, 128)
    kern = functools.partial(_attn_conv_kernel, K=K,
                             maximum=(magnitude_type == "similarity"))
    full = pl.BlockSpec((1, d_k, S), lambda bh, it: (bh, 0, 0))
    rows = pl.BlockSpec((1, d_k, TI), lambda bh, it: (bh, 0, it))
    return pl.pallas_call(
        kern,
        out_shape=jax.ShapeDtypeStruct((BH, d_k, S), jnp.float32),
        grid=(BH, ni),
        in_specs=[
            full,                                              # k (column norms)
            full,                                              # q (dot columns)
            rows,                                              # k row slice
            rows,                                              # q row slice
            full,                                              # v
            pl.BlockSpec((K, d_k, d_k), lambda bh, it: (0, 0, 0)),
            pl.BlockSpec((d_k, 1), lambda bh, it: (0, 0)),
        ],
        out_specs=pl.BlockSpec((1, d_k, TI), lambda bh, it: (bh, 0, it)),
        scratch_shapes=[
            pltpu.VMEM((d_k, K * S_pad), jnp.float32),
            pltpu.VMEM((TI, K * S_pad), jnp.float32),
        ],
        compiler_params=pltpu.CompilerParams(
            dimension_semantics=("parallel", "parallel")),
    )(k, q, k, q, v, conv_w_k_first, conv_b.reshape(d_k, 1))


# ----------------------------------------------------------------------------
# Kernel C: W_o projection, result written directly in (B, S, D)
#   out[b, s_out, d] = sum_{s_in} y[b, d, s_in] * Wo[s_out, s_in] + bo[s_out]
# ----------------------------------------------------------------------------
def _out_proj_kernel(y_ref, w_ref, b_ref, o_ref):
    yb = y_ref[0]                                   # (TD, S_in)
    o_ref[0] = lax.dot_general(w_ref[...], yb, (((1,), (1,)), ((), ())),
                               preferred_element_type=jnp.float32) + b_ref[...]


def pallas_out_proj(y, w, b, *, d_tile=None):
    B, D, S = y.shape
    TD = d_tile if d_tile is not None else _d_tile(D)
    nd = pl.cdiv(D, TD)
    return pl.pallas_call(
        _out_proj_kernel,
        out_shape=jax.ShapeDtypeStruct((B, S, D), jnp.float32),
        grid=(B, nd),
        in_specs=[
            pl.BlockSpec((1, TD, S), lambda b_, d: (b_, d, 0)),
            pl.BlockSpec((S, S), lambda b_, d: (0, 0)),
            pl.BlockSpec((S, 1), lambda b_, d: (0, 0)),
        ],
        out_specs=pl.BlockSpec((1, S, TD), lambda b_, d: (b_, 0, d)),
        compiler_params=pltpu.CompilerParams(
            dimension_semantics=("parallel", "parallel")),
    )(y, w, b.reshape(S, 1))


# ----------------------------------------------------------------------------
# Full forward (glue reshapes mirror the PyTorch view/permute gymnastics)
# ----------------------------------------------------------------------------
def multi_head_conv_nn_forward(x, params, *, num_heads, K, magnitude_type,
                               d_tile=None, row_tile=None):
    B, S, D = x.shape
    H = num_heads
    d_k = D // H

    # Fused q/k/v projections: x read once, outputs in (B, D, S).
    q_lin, k_lin, v_lin = pallas_qkv_proj(
        x, params["wq"], params["bq"], params["wk"], params["bk"],
        params["wv"], params["bv"], d_tile=d_tile)

    def to_heads(y):
        # split_head + batch_combine of the torch module:
        # (B, D, S) --free C-order reinterpret--> (B, S, H, d_k)
        #           --transpose--> (B, H, d_k, S) --> (B*H, d_k, S)
        y = y.reshape(B, S, H, d_k)
        y = jnp.transpose(y, (0, 2, 3, 1))
        return y.reshape(B * H, d_k, S)

    q = to_heads(q_lin)
    k = to_heads(k_lin)
    v = to_heads(v_lin)

    # Conv1d weight pre-arranged as (K, d_k_out, d_k_in): lane-dense per-tap tiles.
    conv_w_k_first = jnp.transpose(params["conv_w"], (2, 0, 1))
    conv_out = pallas_attn_conv(q, k, v, conv_w_k_first, params["conv_b"],
                                K=K, magnitude_type=magnitude_type,
                                row_tile=row_tile)                 # (B*H, d_k, S)

    # batch_split + combine_heads (inverse reinterpret).
    y = conv_out.reshape(B, H, d_k, S)
    y = jnp.transpose(y, (0, 3, 1, 2)).reshape(B, D, S)

    # Output projection with the final permute(0, 2, 1) folded into the kernel.
    return pallas_out_proj(y, params["wo"], params["bo"], d_tile=d_tile)


# ----------------------------------------------------------------------------
# Deterministic parameter init (shapes from the module __init__)
# ----------------------------------------------------------------------------
def init_params(key, d_model, num_heads, K, seq_length):
    d_k = d_model // num_heads
    ks = jax.random.split(key, 10)
    lb = 1.0 / np.sqrt(seq_length)          # nn.Linear(seq, seq) bound
    cb = 1.0 / np.sqrt(d_k * K)             # nn.Conv1d(d_k, d_k, K) bound

    def u(kk, shape, bound):
        return jax.random.uniform(kk, shape, jnp.float32, -bound, bound)

    return dict(
        wq=u(ks[0], (seq_length, seq_length), lb), bq=u(ks[1], (seq_length,), lb),
        wk=u(ks[2], (seq_length, seq_length), lb), bk=u(ks[3], (seq_length,), lb),
        wv=u(ks[4], (seq_length, seq_length), lb), bv=u(ks[5], (seq_length,), lb),
        wo=u(ks[6], (seq_length, seq_length), lb), bo=u(ks[7], (seq_length,), lb),
        conv_w=u(ks[8], (d_k, d_k, K), cb), conv_b=u(ks[9], (d_k,), cb),
    )


# ----------------------------------------------------------------------------
# Pure-JAX reference (mirrors the torch forward) used only for validation
# ----------------------------------------------------------------------------
def _topk_indices(mag, K, maximum):
    BH, t, _ = mag.shape
    col = jnp.arange(t, dtype=jnp.int32)
    work = mag
    idxs = []
    for _ in range(K):
        best = (jnp.max if maximum else jnp.min)(work, axis=-1, keepdims=True)
        pos = jnp.min(jnp.where(work == best, col, t), axis=-1)      # (BH, t)
        idxs.append(pos)
        onehot = col[None, None, :] == pos[..., None]
        work = jnp.where(onehot, -jnp.inf if maximum else jnp.inf, work)
    return jnp.stack(idxs, axis=-1)                                   # (BH, t, K)


def reference_forward(x, params, *, num_heads, K, magnitude_type):
    B, S, D = x.shape
    d_k = D // num_heads
    H = num_heads
    hi = jax.lax.Precision.HIGHEST

    xp = jnp.transpose(x, (0, 2, 1))                                  # (B, D, S)

    def lin(z, w, b):
        return jnp.einsum("...i,oi->...o", z, w, precision=hi) + b

    def to_bh(y):
        y = y.reshape(B, S, H, d_k)
        y = jnp.transpose(y, (0, 2, 3, 1))
        return y.reshape(B * H, d_k, S)

    q = to_bh(lin(xp, params["wq"], params["bq"]))
    k = to_bh(lin(xp, params["wk"], params["bk"]))
    v = to_bh(lin(xp, params["wv"], params["bv"]))

    if magnitude_type == "similarity":
        kn = k / jnp.maximum(jnp.sqrt(jnp.sum(k * k, axis=1, keepdims=True)), 1e-12)
        qn = q / jnp.maximum(jnp.sqrt(jnp.sum(q * q, axis=1, keepdims=True)), 1e-12)
        mag = jnp.einsum("bci,bcj->bij", kn, qn, precision=hi)
        mag = jnp.clip(mag, 0.0, None)
        maximum = True
    else:
        k2 = jnp.sum(k * k, axis=1)[:, None, :]                       # (BH, 1, S)
        q2 = jnp.sum(q * q, axis=1)[:, :, None]                       # (BH, S, 1)
        dot = jnp.einsum("bci,bcj->bij", k, q, precision=hi)
        mag = jnp.sqrt(jnp.clip(k2 + q2 - 2.0 * dot, 0.0, None))
        maximum = False

    idx = _topk_indices(mag, K, maximum)                              # (BH, S, K)
    prime = jnp.take_along_axis(v[:, :, None, :], idx[:, None, :, :], axis=3)
    conv_out = (
        jnp.einsum("ocj,bcij->boi", params["conv_w"], prime, precision=hi)
        + params["conv_b"][None, :, None]
    )                                                                 # (BH, d_k, S)

    y = conv_out.reshape(B, H, d_k, S)
    y = jnp.transpose(y, (0, 3, 1, 2)).reshape(B, D, S)
    out = lin(y, params["wo"], params["bo"])
    return jnp.transpose(out, (0, 2, 1))


# ----------------------------------------------------------------------------
if __name__ == "__main__":
    key = jax.random.PRNGKey(0)

    # ---- Config 1: toy shapes, strict check against the pure-JAX reference.
    B, S, D, H, K = 2, 16, 32, 4, 4          # batch, seq_length, d_model, heads, K
    kx, kp, key = jax.random.split(key, 3)
    x = jax.random.normal(kx, (B, S, D), jnp.float32)
    params = init_params(kp, D, H, K, S)
    for mt in ("distance", "similarity"):
        out = multi_head_conv_nn_forward(x, params, num_heads=H, K=K,
                                         magnitude_type=mt)
        out = jax.block_until_ready(out)
        assert out.shape == (B, S, D) and out.dtype == jnp.float32
        ref = reference_forward(x, params, num_heads=H, K=K, magnitude_type=mt)
        np.testing.assert_allclose(np.asarray(out), np.asarray(ref),
                                   rtol=2e-2, atol=2e-2)

    # ---- Config 2: exercises d_model tiling (D > 256) and a ragged row tile
    # (S > 256, S % TI != 0).  Validated by comparing the auto-tiled run against
    # a forced single-tile run (identical in-kernel math, so tile-independent);
    # an independent XLA reference is avoided here because near-tie top-K flips
    # under f32 reduction-order differences would make it flaky at this size.
    B, S, D, H, K = 1, 320, 384, 4, 3
    kx, kp, key = jax.random.split(key, 3)
    x = jax.random.normal(kx, (B, S, D), jnp.float32)
    params = init_params(kp, D, H, K, S)
    out_tiled = jax.block_until_ready(
        multi_head_conv_nn_forward(x, params, num_heads=H, K=K,
                                   magnitude_type="distance"))
    out_single = jax.block_until_ready(
        multi_head_conv_nn_forward(x, params, num_heads=H, K=K,
                                   magnitude_type="distance",
                                   d_tile=D, row_tile=S))
    assert out_tiled.shape == (B, S, D) and out_tiled.dtype == jnp.float32
    assert bool(jnp.all(jnp.isfinite(out_tiled)))
    np.testing.assert_allclose(np.asarray(out_tiled), np.asarray(out_single),
                               rtol=1e-5, atol=1e-5)

    print("KERNEL_OK")
</pallas_src>

<mosaic_0001>
module attributes {stable_mosaic.version = 11 : i64} {
  func.func @_qkv_kernel(%arg0: i32, %arg1: i32, %arg2: memref<1x16x32xf32, #tpu.memory_space<vmem>>, %arg3: memref<16x16xf32, #tpu.memory_space<vmem>>, %arg4: memref<16x16xf32, #tpu.memory_space<vmem>>, %arg5: memref<16x16xf32, #tpu.memory_space<vmem>>, %arg6: memref<1x16xf32, #tpu.memory_space<vmem>>, %arg7: memref<1x16xf32, #tpu.memory_space<vmem>>, %arg8: memref<1x16xf32, #tpu.memory_space<vmem>>, %arg9: memref<1x32x16xf32, #tpu.memory_space<vmem>>, %arg10: memref<1x32x16xf32, #tpu.memory_space<vmem>>, %arg11: memref<1x32x16xf32, #tpu.memory_space<vmem>>) attributes {dimension_semantics = [#tpu.dimension_semantics<parallel>, #tpu.dimension_semantics<parallel>], iteration_bounds = array<i64: 2, 1>, scalar_prefetch = 0 : i64, scratch_operands = 0 : i64, tpu.core_type = #tpu.core_type<tc>, window_params = [{transform_indices = @transform_0, window_bounds = array<i64: 1, 16, 32>}, {pipeline_mode = #tpu.pipeline_mode<synchronous>, transform_indices = @transform_1, window_bounds = array<i64: 16, 16>}, {pipeline_mode = #tpu.pipeline_mode<synchronous>, transform_indices = @transform_2, window_bounds = array<i64: 16, 16>}, {pipeline_mode = #tpu.pipeline_mode<synchronous>, transform_indices = @transform_3, window_bounds = array<i64: 16, 16>}, {pipeline_mode = #tpu.pipeline_mode<synchronous>, transform_indices = @transform_4, window_bounds = array<i64: 1, 16>}, {pipeline_mode = #tpu.pipeline_mode<synchronous>, transform_indices = @transform_5, window_bounds = array<i64: 1, 16>}, {pipeline_mode = #tpu.pipeline_mode<synchronous>, transform_indices = @transform_6, window_bounds = array<i64: 1, 16>}, {transform_indices = @transform_7, window_bounds = array<i64: 1, 32, 16>}, {transform_indices = @transform_8, window_bounds = array<i64: 1, 32, 16>}, {transform_indices = @transform_9, window_bounds = array<i64: 1, 32, 16>}]} {
    %c0 = arith.constant 0 : index
    %c0_0 = arith.constant 0 : index
    %c0_1 = arith.constant 0 : index
    %0 = vector.load %arg2[%c0, %c0_0, %c0_1] : memref<1x16x32xf32, #tpu.memory_space<vmem>>, vector<1x16x32xf32>
    %1 = vector.shape_cast %0 : vector<1x16x32xf32> to vector<16x32xf32>
    %c0_2 = arith.constant 0 : index
    %c0_3 = arith.constant 0 : index
    %2 = vector.load %arg3[%c0_2, %c0_3] : memref<16x16xf32, #tpu.memory_space<vmem>>, vector<16x16xf32>
    %cst = arith.constant dense<0.000000e+00> : vector<32x16xf32>
    %3 = tpu.matmul %1, %2, %cst {dimension_numbers = #tpu.dot_dimension_numbers<[0], [1], [1], [0], [0, 1, 1, 0], [], []>} : vector<16x32xf32>, vector<16x16xf32>, vector<32x16xf32> -> vector<32x16xf32>
    %c0_4 = arith.constant 0 : index
    %c0_5 = arith.constant 0 : index
    %4 = vector.load %arg6[%c0_4, %c0_5] : memref<1x16xf32, #tpu.memory_space<vmem>>, vector<1x16xf32>
    %5 = vector.broadcast %4 : vector<1x16xf32> to vector<32x16xf32>
    %6 = arith.addf %3, %5 : vector<32x16xf32>
    %c0_6 = arith.constant 0 : index
    %c0_7 = arith.constant 0 : index
    %c0_8 = arith.constant 0 : index
    %7 = vector.load %arg9[%c0_6, %c0_7, %c0_8] : memref<1x32x16xf32, #tpu.memory_space<vmem>>, vector<1x32x16xf32>
    %8 = vector.shape_cast %7 : vector<1x32x16xf32> to vector<32x16xf32>
    %9 = vector.shape_cast %6 : vector<32x16xf32> to vector<1x32x16xf32>
    tpu.vector_store %arg9[%c0_6, %c0_7, %c0_8], %9 {strides = array<i32>} : memref<1x32x16xf32, #tpu.memory_space<vmem>>, vector<1x32x16xf32>,
    %c0_9 = arith.constant 0 : index
    %c0_10 = arith.constant 0 : index
    %10 = vector.load %arg4[%c0_9, %c0_10] : memref<16x16xf32, #tpu.memory_space<vmem>>, vector<16x16xf32>
    %cst_11 = arith.constant dense<0.000000e+00> : vector<32x16xf32>
    %11 = tpu.matmul %1, %10, %cst_11 {dimension_numbers = #tpu.dot_dimension_numbers<[0], [1], [1], [0], [0, 1, 1, 0], [], []>} : vector<16x32xf32>, vector<16x16xf32>, vector<32x16xf32> -> vector<32x16xf32>
    %c0_12 = arith.constant 0 : index
    %c0_13 = arith.constant 0 : index
    %12 = vector.load %arg7[%c0_12, %c0_13] : memref<1x16xf32, #tpu.memory_space<vmem>>, vector<1x16xf32>
    %13 = vector.broadcast %12 : vector<1x16xf32> to vector<32x16xf32>
    %14 = arith.addf %11, %13 : vector<32x16xf32>
    %c0_14 = arith.constant 0 : index
    %c0_15 = arith.constant 0 : index
    %c0_16 = arith.constant 0 : index
    %15 = vector.load %arg10[%c0_14, %c0_15, %c0_16] : memref<1x32x16xf32, #tpu.memory_space<vmem>>, vector<1x32x16xf32>
    %16 = vector.shape_cast %15 : vector<1x32x16xf32> to vector<32x16xf32>
    %17 = vector.shape_cast %14 : vector<32x16xf32> to vector<1x32x16xf32>
    tpu.vector_store %arg10[%c0_14, %c0_15, %c0_16], %17 {strides = array<i32>} : memref<1x32x16xf32, #tpu.memory_space<vmem>>, vector<1x32x16xf32>,
    %c0_17 = arith.constant 0 : index
    %c0_18 = arith.constant 0 : index
    %18 = vector.load %arg5[%c0_17, %c0_18] : memref<16x16xf32, #tpu.memory_space<vmem>>, vector<16x16xf32>
    %cst_19 = arith.constant dense<0.000000e+00> : vector<32x16xf32>
    %19 = tpu.matmul %1, %18, %cst_19 {dimension_numbers = #tpu.dot_dimension_numbers<[0], [1], [1], [0], [0, 1, 1, 0], [], []>} : vector<16x32xf32>, vector<16x16xf32>, vector<32x16xf32> -> vector<32x16xf32>
    %c0_20 = arith.constant 0 : index
    %c0_21 = arith.constant 0 : index
    %20 = vector.load %arg8[%c0_20, %c0_21] : memref<1x16xf32, #tpu.memory_space<vmem>>, vector<1x16xf32>
    %21 = vector.broadcast %20 : vector<1x16xf32> to vector<32x16xf32>
    %22 = arith.addf %19, %21 : vector<32x16xf32>
    %c0_22 = arith.constant 0 : index
    %c0_23 = arith.constant 0 : index
    %c0_24 = arith.constant 0 : index
    %23 = vector.load %arg11[%c0_22, %c0_23, %c0_24] : memref<1x32x16xf32, #tpu.memory_space<vmem>>, vector<1x32x16xf32>
    %24 = vector.shape_cast %23 : vector<1x32x16xf32> to vector<32x16xf32>
    %25 = vector.shape_cast %22 : vector<32x16xf32> to vector<1x32x16xf32>
    tpu.vector_store %arg11[%c0_22, %c0_23, %c0_24], %25 {strides = array<i32>} : memref<1x32x16xf32, #tpu.memory_space<vmem>>, vector<1x32x16xf32>,
    return
  }
  func.func @transform_0(%arg0: i32, %arg1: i32) -> (i32, i32, i32) {
    %c0_i32 = arith.constant 0 : i32
    %c0_i32_0 = arith.constant 0 : i32
    return %arg0, %c0_i32, %arg1 : i32, i32, i32
  }
  func.func @transform_1(%arg0: i32, %arg1: i32) -> (i32, i32) {
    %c0_i32 = arith.constant 0 : i32
    %c0_i32_0 = arith.constant 0 : i32
    %c0_i32_1 = arith.constant 0 : i32
    return %c0_i32, %c0_i32_0 : i32, i32
  }
  func.func @transform_2(%arg0: i32, %arg1: i32) -> (i32, i32) {
    %c0_i32 = arith.constant 0 : i32
    %c0_i32_0 = arith.constant 0 : i32
    %c0_i32_1 = arith.constant 0 : i32
    return %c0_i32, %c0_i32_0 : i32, i32
  }
  func.func @transform_3(%arg0: i32, %arg1: i32) -> (i32, i32) {
    %c0_i32 = arith.constant 0 : i32
    %c0_i32_0 = arith.constant 0 : i32
    %c0_i32_1 = arith.constant 0 : i32
    return %c0_i32, %c0_i32_0 : i32, i32
  }
  func.func @transform_4(%arg0: i32, %arg1: i32) -> (i32, i32) {
    %c0_i32 = arith.constant 0 : i32
    %c0_i32_0 = arith.constant 0 : i32
    %c0_i32_1 = arith.constant 0 : i32
    return %c0_i32, %c0_i32_0 : i32, i32
  }
  func.func @transform_5(%arg0: i32, %arg1: i32) -> (i32, i32) {
    %c0_i32 = arith.constant 0 : i32
    %c0_i32_0 = arith.constant 0 : i32
    %c0_i32_1 = arith.constant 0 : i32
    return %c0_i32, %c0_i32_0 : i32, i32
  }
  func.func @transform_6(%arg0: i32, %arg1: i32) -> (i32, i32) {
    %c0_i32 = arith.constant 0 : i32
    %c0_i32_0 = arith.constant 0 : i32
    %c0_i32_1 = arith.constant 0 : i32
    return %c0_i32, %c0_i32_0 : i32, i32
  }
  func.func @transform_7(%arg0: i32, %arg1: i32) -> (i32, i32, i32) {
    %c0_i32 = arith.constant 0 : i32
    %c0_i32_0 = arith.constant 0 : i32
    return %arg0, %arg1, %c0_i32 : i32, i32, i32
  }
  func.func @transform_8(%arg0: i32, %arg1: i32) -> (i32, i32, i32) {
    %c0_i32 = arith.constant 0 : i32
    %c0_i32_0 = arith.constant 0 : i32
    return %arg0, %arg1, %c0_i32 : i32, i32, i32
  }
  func.func @transform_9(%arg0: i32, %arg1: i32) -> (i32, i32, i32) {
    %c0_i32 = arith.constant 0 : i32
    %c0_i32_0 = arith.constant 0 : i32
    return %arg0, %arg1, %c0_i32 : i32, i32, i32
  }
}

</mosaic_0001>

<bundles_post_ra>
// kernel: tpu_custom_call.1
= control target key start
LH: loop header
LB: loop body
LE: loop exit
PB: predicated region body
PF: predicated region fallthrough
CT: control target
= control target key end

     0   :  { %s1788_s0 = inlined_call_operand.hbm [shape: f32[2,16,32], index: 0, kind: input, shape index: {}]   ;;  %s1789_s1 = inlined_call_operand.hbm [shape: f32[16,16], index: 1, kind: input, shape index: {}]   ;;  %s1790_s2 = inlined_call_operand.hbm [shape: f32[16,16], index: 2, kind: input, shape index: {}]   ;;  %s1791_s3 = inlined_call_operand.hbm [shape: f32[16,16], index: 3, kind: input, shape index: {}]   ;;  %s1792_s4 = inlined_call_operand.vmem [shape: f32[1,16], index: 4, kind: input, shape index: {}]   ;;  %s1793_s5 = inlined_call_operand.vmem [shape: f32[1,16], index: 5, kind: input, shape index: {}]   ;;  %s1794_s6 = inlined_call_operand.vmem [shape: f32[1,16], index: 6, kind: input, shape index: {}]   ;;  %s1795_s7 = inlined_call_operand.vmem [shape: f32[2,32,16], index: 7, kind: output, shape index: {0}]   ;;  %s1796_s8 = inlined_call_operand.vmem [shape: f32[2,32,16], index: 8, kind: output, shape index: {1}]   ;;  %s1797_s9 = inlined_call_operand.vmem [shape: f32[2,32,16], index: 9, kind: output, shape index: {2}]  }
   0x1   :  { %1802 = sst [smem:[#allocation12_spill]] %s1794_s6 }
   0x2   :  { %1803 = sst [smem:[#allocation13_spill]] %s1796_s8 }
   0x3   :  { %1804 = sst [smem:[#allocation14_spill]] %s1797_s9 }
   0x4   :  { %15 = vsyncpa [#allocation3], 0 }
   0x5   :  { %17 = vsyncpa [#allocation3 + $0x1], 0 }
   0x6   :  { %18 = vsyncpa [#allocation5], 0 }
   0x7   :  { %19 = vsyncpa [#allocation8], 0  ;;  %s1487_s30 = smov 0   ;;  %s1489_s10 = smov 0  }
   0x8   :  { %s1491_s11 = smov 0   ;;  %s1493_s12 = smov 0  }
   0x9   :  { %s1495_s13 = smov 0   ;;  %s1497_s14 = smov 0  }
   0xa LB: > { %s1052_s15 = sadd.s32 4294967295, %s1429_s14   ;;  %p59_p0 = scmp.ne.s32.totalorder %s1413_s10, %s1409_s30  ;;  %s1429_s14 = sphi %s1497_s14, %s25_s14   ;;  %s1425_s13 = sphi %s1495_s13, %s1823_s13   ;;  %s1421_s12 = sphi %s1493_s12, %s1822_s12   ;;  %s1417_s11 = sphi %s1491_s11, %s1821_s11   ;;  %s1413_s10 = sphi %s1489_s10, %s1820_s10   ;;  %s1409_s30 = sphi %s1487_s30, %s1819_s30  }
   0xb   : > { %p1517_p1 = scmp.eq.s32.totalorder %s1052_s15, 0  ;;  %p1054_p2 = scmp.ge.s32.totalorder %s1429_s14, 1 }
   0xc   : > { %p280_p3 = scmp.lt.s32.totalorder %s1429_s14, 3  ;;  %s1431_s19 = smov [#allocation4]  }
   0xd   : > { %s1805_s16 = scalar_select %p1517_p1, 1, 0 }
   0xe   : > { %p1525_p4 = por %p1517_p1, %p59_p0  ;;  %p1529_p5 = pnand %p1054_p2, %p280_p3 }
   0xf   : > { %s292_s20 = sshll.u32 %s1431_s19, 4  ;;  %s1432_s22 = smov [#allocation6]   ;;  %s1533_s20 = int_to_ptr.vmem [resolvable:$true] %s292_s20 }
  0x10   : > { %s1806_s17 = scalar_select %p1525_p4, 1, 0 }
  0x11   : > { %s1807_s18 = scalar_select %p1529_p5, 1, 0 }
  0x12   : > { %p1182_p6 = pneg %p1529_p5  ;;  %s305_s23 = sshll.u32 %s1432_s22, 4  ;;  %s1543_s23 = int_to_ptr.vmem [resolvable:$true] %s305_s23 }
  0x13   : > { %s1433_s24 = smov [#allocation7]   ;;  %s1257_s28 = scalar_lea.hbm %s1789_s1, 256 }
  0x14   : > { %p1539_p7 = pnand %p1182_p6, %p1517_p1  ;;  %s1545_s25 = sshll.u32 %s1433_s24, 4  ;;  %s319_s25 = int_to_ptr.vmem [resolvable:$true] %s1545_s25 }
  0x15   : > { %p1258_p8 = scmp.ne.s32.totalorder %s1789_s1, %s1257_s28  ;;  %p1264_p12 = scmp.lt.u32.totalorder %s1257_s28, %s1789_s1 }
  0x16   : > { %p1555_p9 = pneg %p1539_p7 }
  0x18   : > { %p1260_p10 = pnand %p1555_p9, %p1258_p8 }
  0x1a   : > { %p1261_p11 = pneg %p1260_p10 }
  0x1c   : > { %p1266_p13 = pnand %p1264_p12, %p1261_p11 }
  0x1e   : > { %1269 = shalt.err (!%p1266_p13)
}
  0x1f   : > { %s1270_s24 = scalar_lea.vmem %s1533_s20, 256  ;;  %p1278_p6 = scmp.lt.s32.totalorder %s1533_s20, %s1533_s20 }
  0x20   : > { %p1271_p0 = scmp.ne.s32.totalorder %s1533_s20, %s1270_s24  ;;  %p1279_p1 = scmp.lt.s32.totalorder %s1270_s24, %s1270_s24 }
  0x22   : > { %p1273_p2 = pnand %p1271_p0, %p1555_p9  ;;  %p1280_p8 = por %p1279_p1, %p1278_p6 }
  0x24   : > { %p1274_p3 = pneg %p1273_p2 }
  0x26   : > { %p1281_p10 = pnand %p1280_p8, %p1274_p3 }
  0x28   : > { %1284 = shalt.err (!%p1281_p10)
}
  0x29   : > { %s1434_s26 = smov 128   ;;  %s1435_s27 = smov 8  }
  0x2a   : > { %1185 = dma.hbm_to_vmem [thread:$0]  (!%p1539_p7), %s1789_s1, 256, %s1533_s20, [#allocation5], %s1434_s26, %s1434_s26, %s1435_s27  }
  0x2b   : > { %s1285_s22 = scalar_lea.hbm %s1790_s2, 256 }
  0x2c   : > { %p1286_p1 = scmp.ne.s32.totalorder %s1790_s2, %s1285_s22  ;;  %p1292_p13 = scmp.lt.u32.totalorder %s1285_s22, %s1790_s2 }
  0x2e   : > { %p1288_p11 = pnand %p1286_p1, %p1555_p9 }
  0x30   : > { %p1289_p12 = pneg %p1288_p11 }
  0x32   : > { %p1294_p0 = pnand %p1292_p13, %p1289_p12 }
  0x34   : > { %1297 = shalt.err (!%p1294_p0)
}
  0x35   : > { %s1298_s20 = scalar_lea.vmem %s1543_s23, 256  ;;  %p1306_p8 = scmp.lt.s32.totalorder %s1543_s23, %s1543_s23 }
  0x36   : > { %p1299_p2 = scmp.ne.s32.totalorder %s1543_s23, %s1298_s20  ;;  %p1307_p10 = scmp.lt.s32.totalorder %s1298_s20, %s1298_s20 }
  0x38   : > { %p1301_p3 = pnand %p1299_p2, %p1555_p9  ;;  %p1308_p1 = por %p1307_p10, %p1306_p8 }
  0x3a   : > { %p1302_p6 = pneg %p1301_p3 }
  0x3c   : > { %p1309_p11 = pnand %p1308_p1, %p1302_p6 }
  0x3e   : > { %1312 = shalt.err (!%p1309_p11)
}
  0x3f   : > { %1188 = dma.hbm_to_vmem [thread:$0]  (!%p1539_p7), %s1790_s2, 256, %s1543_s23, [#allocation5], %s1434_s26, %s1434_s26, %s1435_s27  }
  0x40   : > { %s1313_s29 = scalar_lea.hbm %s1791_s3, 256 }
  0x41   : > { %p1314_p12 = scmp.ne.s32.totalorder %s1791_s3, %s1313_s29  ;;  %p1320_p2 = scmp.lt.u32.totalorder %s1313_s29, %s1791_s3 }
  0x43   : > { %p1316_p13 = pnand %p1314_p12, %p1555_p9 }
  0x45   : > { %p1317_p0 = pneg %p1316_p13 }
  0x47   : > { %p1322_p3 = pnand %p1320_p2, %p1317_p0 }
  0x49   : > { %1325 = shalt.err (!%p1322_p3)
}
  0x4a   : > { %s1326_s20 = scalar_lea.vmem %s319_s25, 256  ;;  %p1334_p1 = scmp.lt.s32.totalorder %s319_s25, %s319_s25 }
  0x4b   : > { %p1327_p6 = scmp.ne.s32.totalorder %s319_s25, %s1326_s20  ;;  %p1335_p11 = scmp.lt.s32.totalorder %s1326_s20, %s1326_s20 }
  0x4d   : > { %p1329_p8 = pnand %p1327_p6, %p1555_p9  ;;  %p1336_p4 = por %p1335_p11, %p1334_p1 }
  0x4f   : > { %p1330_p10 = pneg %p1329_p8 }
  0x51   : > { %p1337_p5 = pnand %p1336_p4, %p1330_p10 }
  0x53   : > { %1340 = shalt.err (!%p1337_p5)
}
  0x54   : > { %1191 = dma.hbm_to_vmem [thread:$0]  (!%p1539_p7), %s1791_s3, 256, %s319_s25, [#allocation8], %s1434_s26, %s1434_s26, %s1435_s27  }
  0x55   : > { %s37_s15 = sadd.s32 1, %s1425_s13  ;;  %p53_p4 = scmp.ne.s32.totalorder %s1417_s11, %s1413_s10 }
  0x56   : > { %p39_p5 = scmp.ge.s32.totalorder %s37_s15, 2  ;;  %p54_p9 = scmp.eq.s32.totalorder %s1429_s14, 0 }
  0x57   : > { %s46_s21 = sadd.s32 1, %s1417_s11  ;;  %s341_s8 = sand.u32 1, %s1417_s11  }
  0x58   : > { %s1825_s15 = smov (%p39_p5, %s37_s15), 0  ;;  %p55_p12 = por %p54_p9, %p53_p4 }
  0x59   : > { %p1199_p13 = scmp.lt.s32.totalorder %s1429_s14, 2  ;;  %s41_s9 = ssub.s32 %s1425_s13, %s1825_s15 }
  0x5a   : > { %s1059_s28 = sshll.u32 %s341_s8, 4  ;;  %p44_p0 = scmp.eq.s32.totalorder %s41_s9, 0 }
  0x5b   : > { %s1096_s29 = sshll.u32 %s1425_s13, 8  ;;  %s345_s30 = scalar_lea.vmem [#allocation2], %s1059_s28 }
  0x5c   : > { %s353_s19 = sshll.u32 %s345_s30, 4  ;;  %s1645_s20 = scalar_lea.hbm %s1788_s0, %s1096_s29  ;;  %s1647_s19 = int_to_ptr.vmem [resolvable:$true] %s353_s19 }
  0x5d   : > { %s1640_s22 = scalar_select %p44_p0, %s1417_s11, %s46_s21  }
  0x5e   : > { %p1649_p7 = pnand %p1199_p13, %p55_p12  ;;  %s1653_s6 = scalar_lea.sflag [#allocation3], %s341_s8 }
  0x5f   : > { %s1341_s21 = scalar_lea.hbm %s1645_s20, 256  ;;  %s1346_s29 = scalar_lea.hbm %s1788_s0, 512 }
  0x60   : > { %p1342_p2 = scmp.ne.s32.totalorder %s1645_s20, %s1341_s21  ;;  %p1343_p3 = pneg %p1649_p7 }
  0x61   : > { %p1347_p10 = scmp.lt.u32.totalorder %s1645_s20, %s1788_s0  ;;  %p1348_p1 = scmp.lt.u32.totalorder %s1346_s29, %s1341_s21 }
  0x62   : > { %p1344_p6 = pnand %p1343_p3, %p1342_p2  ;;  %p1350_p4 = scmp.lt.u32.totalorder %s1341_s21, %s1645_s20 }
  0x63   : > { %p1349_p11 = por %p1348_p1, %p1347_p10 }
  0x64   : > { %p1345_p8 = pneg %p1344_p6 }
  0x65   : > { %p1351_p5 = por %p1350_p4, %p1349_p11 }
  0x67   : > { %p1352_p9 = pnand %p1351_p5, %p1345_p8 }
  0x69   : > { %1355 = shalt.err (!%p1352_p9)
}
  0x6a   : > { %s1356_s8 = scalar_lea.vmem %s1647_s19, 256  ;;  %s1436_s24 = smov [#allocation2]  }
  0x6b   : > { %p1357_p12 = scmp.ne.s32.totalorder %s1647_s19, %s1356_s8  ;;  %s1361_s9 = sshll.u32 %s1436_s24, 4  ;;  %s1362_s9 = int_to_ptr.vmem [resolvable:$false] %s1361_s9 }
  0x6c   : > { %s1363_s28 = scalar_lea.vmem %s1362_s9, 512  ;;  %p1364_p2 = scmp.lt.s32.totalorder %s1647_s19, %s1362_s9 }
  0x6d   : > { %p1359_p13 = pnand %p1357_p12, %p1343_p3  ;;  %p1365_p6 = scmp.lt.s32.totalorder %s1363_s28, %s1356_s8 }
  0x6f   : > { %p1360_p0 = pneg %p1359_p13  ;;  %p1366_p10 = por %p1365_p6, %p1364_p2 }
  0x71   : > { %p1367_p1 = pnand %p1366_p10, %p1360_p0 }
  0x73   : > { %1370 = shalt.err (!%p1367_p1)
}
  0x74   : > { %1195 = dma.hbm_to_vmem [thread:$0]  (!%p1649_p7), %s1645_s20, 256, %s1647_s19, %s1653_s6, %s1434_s26, %s1434_s26, %s1435_s27  }
  0x75   : > { %p1811_p3 = scmp.ne.s32.totalorder %s1807_s18, 0 }
  0x76   : > { %s367_s21 = sand.u32 (!%p1811_p3), 1, %s1413_s10   ;;  %p1812_p8 = scmp.ne.s32.totalorder (!%p1811_p3), %s1806_s17, 0 }
  0x77   : > { %365 = sbr.rel (%p1811_p3) target bundleno = 494 (0x1ee), region = 48  ;;  %s1063_s29 = sshll.u32 (!%p1811_p3), %s367_s21, 4 }
  0x78   : > { %s368_s30 = scalar_lea.sflag (!%p1811_p3), [#allocation3], %s367_s21  ;;  %s371_s25 = scalar_lea.vmem (!%p1811_p3), [#allocation2], %s1063_s29 }
  0x7e   : > { %1396 = dma.done.wait (%p1812_p8), %s368_s30, 256  }
  0x7f   : > { %1398 = vsyncadd (%p1812_p8), %s368_s30, 4294967040  ;;  %p1813_p11 = scmp.ne.s32.totalorder %s1805_s16, 0 }
  0x81   : > { %1400 = dma.done.wait (%p1813_p11), [#allocation5], 512  }
  0x82   : > { %1402 = vsyncadd (%p1813_p11), [#allocation5], 4294966784 }
  0x83   : > { %1404 = dma.done.wait (%p1813_p11), [#allocation8], 256  }
  0x84   : > { %1406 = vsyncadd (%p1813_p11), [#allocation8], 4294967040  ;;  %vm513_vm0 = vcmask 130048   ;;  %v470_v0 = vld [vmem:[%s371_s25] sm:$0xff]  ;;  %v473_v3 = vld [vmem:[#allocation4 + $0x8] sm:$0xff]  ;;  %p441_p7 = scmp.lt.s32.totalorder %s1421_s12, 1 }
  0x85   : > { %v472_v1 = vld [vmem:[#allocation4] sm:$0xff]  ;;  %vm1701_vm1 = vmpackc.low %vm513_vm0, %vm513_vm0  ;;  %481 = vxpose.xlu0.b32.start [1/2] (short) (narrow) %v470_v0, 32  ;;  %v621_v4 = vld [vmem:[#allocation6] sm:$0xff]  ;;  %s1816_s24 = sld [smem:[#allocation13_spill]]  ;;  %s1817_s21 = sld [smem:[#allocation12_spill]] }
  0x86   : > { %v622_v5 = vld [vmem:[#allocation6 + $0x8] sm:$0xff]  ;;  %v1148_v7 = vpack.c.bf16 %v473_v3, %v472_v1  ;;  %v725_v9 = vld [vmem:[#allocation7] sm:$0xff]  ;;  %v726_v10 = vld [vmem:[#allocation7 + $0x8] sm:$0xff]  ;;  %s1827_s12 = smov (!%p441_p7, %s1421_s12), 1 }
  0x87   : > { %v471_v6 = vld [vmem:[%s371_s25 + $0x8] sm:$0xff]  ;;  %v1154_v8 = vpack.c.bf16 %v622_v5, %v621_v4  ;;  %v1160_v11 = vpack.c.bf16 %v726_v10, %v725_v9  ;;  %s1735_s16 = sshll.u32 %s1827_s12, 5  ;;  %v1073_v16 = vld [vmem:[%s1792_s4] ss:$0 sm:$0xff]  ;;  %s1818_s25 = sld [smem:[#allocation14_spill]] }
  0x88   : > { %1150 = vmatprep.subr.msk.bf16.mxu0 %vm1701_vm1, %v1148_v7  ;;  %v1080_v17 = vld [vmem:[%s1793_s5] ss:$0 sm:$0xff]  ;;  %s448_s23 = scalar_lea.vmem %s1795_s7, %s1735_s16 }
  0x89   : > { %1156 = vmatprep.subr.msk.bf16.mxu1 %vm1701_vm1, %v1154_v8  ;;  %482 = vxpose.xlu0.b32.end [2/2] (short) (narrow) %v471_v6, 32 }
  0x8a   : > { %1153 = vmatpush3.bf16.xpose.msk.msra.mxu0 %vm1701_vm1, %v1148_v7  ;;  %1159 = vmatpush3.bf16.xpose.msk.msra.mxu1 %vm1701_vm1, %v1154_v8 }
  0x8b   : > { %1162 = vmatprep.subr.msk.bf16.mxu0 %vm1701_vm1, %v1160_v11  ;;  %1166 = vmatprep.subr.msk.bf16.mxu1 %vm1701_vm1, %v1160_v11  ;;  %s458_s12 = scalar_lea.vmem %s1816_s24, %s1735_s16  ;;  %v1087_v34 = vld [vmem:[%s1817_s21] ss:$0 sm:$0xff] }
  0x8d   : > { %s468_s17 = scalar_lea.vmem %s1818_s25, %s1735_s16 }
 0x105   : > { %v497_v12 = vpop.trf.xlu0 }
 0x106   : > { %1122 = vmatprep.mubr.msk.f32.mxu0 %vm513_vm0, %v497_v12  ;;  %1132 = vmatprep.mubr.msk.f32.mxu1 %vm513_vm0, %v497_v12 }
 0x109   : > { %v498_v13 = vpop.trf.xlu0 }
 0x10a   : > { %1123 = vmatmul.mubr.msk.f32.vlgmr.msra.gmra.mrb[0].mxu0 %vm513_vm0, %v498_v13  ;;  %1133 = vmatmul.mubr.msk.f32.vlgmr.msra.gmra.mrb[0].mxu1 %vm513_vm0, %v498_v13 }
 0x10b   : > { %1165 = vmatpush3.bf16.xpose.msk.msra.mxu0 %vm1701_vm1, %v1160_v11  ;;  %1167 = vmatpush3.bf16.xpose.msk.msra.mxu1 %vm1701_vm1, %v1160_v11 }
 0x10d   : > { %v499_v14 = vpop.trf.xlu0 }
 0x10e   : > { %1125 = vmatprep.mubr.msk.f32.mxu0 %vm513_vm0, %v499_v14  ;;  %1135 = vmatprep.mubr.msk.f32.mxu1 %vm513_vm0, %v499_v14 }
 0x111   : > { %v500_v15 = vpop.trf.xlu0 }
 0x112   : > { %1126 = vmatmul.mubr.msk.f32.gmra.mrb[2].mxu0 %vm513_vm0, %v500_v15  ;;  %1136 = vmatmul.mubr.msk.f32.gmra.mrb[2].mxu1 %vm513_vm0, %v500_v15 }
 0x113   : > { %1142 = vmatprep.mubr.msk.f32.mxu0 %vm513_vm0, %v497_v12  ;;  %1145 = vmatprep.mubr.msk.f32.mxu1 %vm513_vm0, %v499_v14 }
 0x116   : > { %1143 = vmatmul.mubr.msk.f32.vlgmr.msra.gmra.mrb[4].mxu0 %vm513_vm0, %v498_v13  ;;  %1146 = vmatmul.mubr.msk.f32.vlgmr.msra.gmra.mrb[4].mxu1 %vm513_vm0, %v500_v15 }
 0x1dd   : > { %v1124_v18 = vpop.f32.mrb[0].mxu0  ;;  %v1134_v19 = vpop.f32.mrb[0].mxu1 }
 0x1de   : > { %v604_v20 = vadd.f32 %v1124_v18, %v1073_v16  ;;  %v708_v21 = vadd.f32 %v1134_v19, %v1080_v17  ;;  %v598_v22 = vpop.f32.mrb[1].mxu0  ;;  %v702_v23 = vpop.f32.mrb[1].mxu1 }
 0x1df   : > { %v599_v24 = vadd.f32 %v1073_v16, %v598_v22  ;;  %v703_v25 = vadd.f32 %v1080_v17, %v702_v23 }
 0x1e0   : > { %618 = vst.msk [vmem:[%s448_s23 + $0x8] sm:$0xff] %vm513_vm0, %v604_v20  ;;  %722 = vst.msk [vmem:[%s458_s12 + $0x8] sm:$0xff] %vm513_vm0, %v708_v21 }
 0x1e1   : > { %617 = vst.msk [vmem:[%s448_s23] sm:$0xff] %vm513_vm0, %v599_v24  ;;  %721 = vst.msk [vmem:[%s458_s12] sm:$0xff] %vm513_vm0, %v703_v25 }
 0x1e5   : > { %v1127_v26 = vpop.f32.mrb[2].mxu0  ;;  %v1137_v27 = vpop.f32.mrb[2].mxu1 }
 0x1e6   : > { %v614_v28 = vadd.f32 %v1127_v26, %v1073_v16  ;;  %v718_v29 = vadd.f32 %v1137_v27, %v1080_v17  ;;  %v608_v30 = vpop.f32.mrb[3].mxu0  ;;  %v712_v31 = vpop.f32.mrb[3].mxu1 }
 0x1e7   : > { %v609_v32 = vadd.f32 %v1073_v16, %v608_v30  ;;  %v713_v33 = vadd.f32 %v1080_v17, %v712_v31 }
 0x1e8   : > { %620 = vst.msk [vmem:[%s448_s23 + $0x18] sm:$0xff] %vm513_vm0, %v614_v28  ;;  %724 = vst.msk [vmem:[%s458_s12 + $0x18] sm:$0xff] %vm513_vm0, %v718_v29 }
 0x1e9   : > { %619 = vst.msk [vmem:[%s448_s23 + $0x10] sm:$0xff] %vm513_vm0, %v609_v32  ;;  %723 = vst.msk [vmem:[%s458_s12 + $0x10] sm:$0xff] %vm513_vm0, %v713_v33  ;;  %v1144_v35 = vpop.f32.mrb[4].mxu0  ;;  %v1147_v36 = vpop.f32.mrb[4].mxu1 }
 0x1ea   : > { %v812_v37 = vadd.f32 %v1144_v35, %v1087_v34  ;;  %v822_v38 = vadd.f32 %v1147_v36, %v1087_v34  ;;  %v806_v39 = vpop.f32.mrb[5].mxu0  ;;  %v816_v40 = vpop.f32.mrb[5].mxu1 }
 0x1eb   : > { %v807_v41 = vadd.f32 %v1087_v34, %v806_v39  ;;  %v817_v42 = vadd.f32 %v1087_v34, %v816_v40 }
 0x1ec   : > { %826 = vst.msk [vmem:[%s468_s17 + $0x8] sm:$0xff] %vm513_vm0, %v812_v37  ;;  %828 = vst.msk [vmem:[%s468_s17 + $0x18] sm:$0xff] %vm513_vm0, %v822_v38 }
 0x1ed   : > { %825 = vst.msk [vmem:[%s468_s17] sm:$0xff] %vm513_vm0, %v807_v41  ;;  %827 = vst.msk [vmem:[%s468_s17 + $0x10] sm:$0xff] %vm513_vm0, %v817_v42 }
 0x1ee PF: > { %s25_s14 = sadd.s32 1, %s1429_s14   ;;  %s1819_s30 = smov %s1413_s10 }
 0x1ef   : > { %p22_p4 = scmp.ge.s32.totalorder %s25_s14, 4   ;;  %s1820_s10 = smov %s1417_s11 }
 0x1f0   : > { %s1821_s11 = smov %s1640_s22  ;;  %s1822_s12 = smov %s1425_s13 }
 0x1f1   : > { %s1823_s13 = smov %s1825_s15  ;;  %24 = sbr.rel (!%p22_p4) target bundleno = 10 (0xa), region = 124 }
 0x1f8   :  { %909 = vsyncpa [#allocation3], 1 }
 0x1f9   :  { %911 = vsyncpa [#allocation3 + $0x1], 1 }
 0x1fa   :  { %912 = vsyncpa [#allocation5], 1 }
 0x1fb   :  { %913 = vsyncpa [#allocation8], 1 }

</bundles_post_ra>
